<compile_context>
chip_gen: v7x
topology: tpu7x:2x2x1
jax: 0.10.0
libtpu: 0.0.40
codegen_flags: <defaults>
</compile_context>

<pallas_src>
import jax
import jax.numpy as jnp
from jax.experimental import pallas as pl
from jax.experimental.pallas import tpu as pltpu

IMAGENET_MEAN = (0.485, 0.456, 0.406)
IMAGENET_STD = (0.229, 0.224, 0.225)

# Spatial tile along the flattened H*W lane axis (multiple of 128).
# 3 channels * 32768 * 4 B ~= 384 KiB per block; with double-buffered input and
# output blocks that is ~1.5 MiB of VMEM -> safe on v5e/v6e (128 MiB) and v7x
# (64 MiB) while still large enough to sit at the HBM roofline.
_MAX_HW_TILE = 32768


def _norm_kernel(x_ref, mean_ref, std_ref, o_ref):
    # x_ref/o_ref: (1, C, hw_tile)   mean_ref/std_ref: (C, 1)
    o_ref[0] = ((x_ref[0] - mean_ref[...]) / std_ref[...]).astype(o_ref.dtype)


@jax.jit
def vgg_norm(x_nchw):
    """x_nchw: (N, 3, H, W). Returns (x - mean) / std with ImageNet stats."""
    N, C, H, W = x_nchw.shape
    HW = H * W
    x = x_nchw.reshape(N, C, HW)

    mean = jnp.asarray(IMAGENET_MEAN, x.dtype).reshape(C, 1)
    std = jnp.asarray(IMAGENET_STD, x.dtype).reshape(C, 1)

    if HW <= _MAX_HW_TILE:
        hw_tile = HW            # full spatial extent: always a legal block dim
    else:
        hw_tile = _MAX_HW_TILE  # multiple of 128; ragged tail handled by Pallas
    grid = (N, pl.cdiv(HW, hw_tile))

    out = pl.pallas_call(
        _norm_kernel,
        out_shape=jax.ShapeDtypeStruct((N, C, HW), x.dtype),
        grid=grid,
        in_specs=[
            pl.BlockSpec((1, C, hw_tile), lambda n, t: (n, 0, t)),
            pl.BlockSpec((C, 1), lambda n, t: (0, 0)),   # mean: resident
            pl.BlockSpec((C, 1), lambda n, t: (0, 0)),   # std: resident
        ],
        out_specs=pl.BlockSpec((1, C, hw_tile), lambda n, t: (n, 0, t)),
        compiler_params=pltpu.CompilerParams(
            # Independent grid axes -> shard across v7x's two TensorCores.
            dimension_semantics=("parallel", "parallel"),
        ),
    )(x, mean, std)
    return out.reshape(N, C, H, W)


if __name__ == "__main__":
    key = jax.random.PRNGKey(0)
    # Small, image-like input: batch=2, 3 channels (required by mean/std), 16x16.
    x = jax.random.uniform(key, (2, 3, 16, 16), jnp.float32)

    out = jax.block_until_ready(vgg_norm(x))

    # Pure-JAX reference of the PyTorch forward.
    mean = jnp.asarray(IMAGENET_MEAN, jnp.float32)[None, :, None, None]
    std = jnp.asarray(IMAGENET_STD, jnp.float32)[None, :, None, None]
    ref = (x - mean) / std

    assert out.shape == x.shape and out.dtype == x.dtype
    assert bool(jnp.all(jnp.isfinite(out)))
    assert bool(jnp.allclose(out, ref, rtol=1e-6, atol=1e-6))
    print("KERNEL_OK")
</pallas_src>

<mosaic_0001>
module attributes {stable_mosaic.version = 11 : i64} {
  func.func @_norm_kernel(%arg0: i32, %arg1: i32, %arg2: memref<1x3x256xf32, #tpu.memory_space<vmem>>, %arg3: memref<3x1xf32, #tpu.memory_space<vmem>>, %arg4: memref<3x1xf32, #tpu.memory_space<vmem>>, %arg5: memref<1x3x256xf32, #tpu.memory_space<vmem>>) attributes {dimension_semantics = [#tpu.dimension_semantics<parallel>, #tpu.dimension_semantics<parallel>], iteration_bounds = array<i64: 2, 1>, scalar_prefetch = 0 : i64, scratch_operands = 0 : i64, tpu.core_type = #tpu.core_type<tc>, window_params = [{transform_indices = @transform_0, window_bounds = array<i64: 1, 3, 256>}, {pipeline_mode = #tpu.pipeline_mode<synchronous>, transform_indices = @transform_1, window_bounds = array<i64: 3, 1>}, {pipeline_mode = #tpu.pipeline_mode<synchronous>, transform_indices = @transform_2, window_bounds = array<i64: 3, 1>}, {transform_indices = @transform_3, window_bounds = array<i64: 1, 3, 256>}]} {
    %c0 = arith.constant 0 : index
    %c0_0 = arith.constant 0 : index
    %c0_1 = arith.constant 0 : index
    %0 = vector.load %arg2[%c0, %c0_0, %c0_1] : memref<1x3x256xf32, #tpu.memory_space<vmem>>, vector<1x3x256xf32>
    %1 = vector.shape_cast %0 : vector<1x3x256xf32> to vector<3x256xf32>
    %c0_2 = arith.constant 0 : index
    %c0_3 = arith.constant 0 : index
    %2 = vector.load %arg3[%c0_2, %c0_3] : memref<3x1xf32, #tpu.memory_space<vmem>>, vector<3x1xf32>
    %3 = vector.broadcast %2 : vector<3x1xf32> to vector<3x256xf32>
    %4 = arith.subf %1, %3 : vector<3x256xf32>
    %c0_4 = arith.constant 0 : index
    %c0_5 = arith.constant 0 : index
    %5 = vector.load %arg4[%c0_4, %c0_5] : memref<3x1xf32, #tpu.memory_space<vmem>>, vector<3x1xf32>
    %6 = vector.broadcast %5 : vector<3x1xf32> to vector<3x256xf32>
    %7 = arith.divf %4, %6 : vector<3x256xf32>
    %c0_6 = arith.constant 0 : index
    %c0_7 = arith.constant 0 : index
    %c0_8 = arith.constant 0 : index
    %8 = vector.load %arg5[%c0_6, %c0_7, %c0_8] : memref<1x3x256xf32, #tpu.memory_space<vmem>>, vector<1x3x256xf32>
    %9 = vector.shape_cast %8 : vector<1x3x256xf32> to vector<3x256xf32>
    %10 = vector.shape_cast %7 : vector<3x256xf32> to vector<1x3x256xf32>
    tpu.vector_store %arg5[%c0_6, %c0_7, %c0_8], %10 {strides = array<i32>} : memref<1x3x256xf32, #tpu.memory_space<vmem>>, vector<1x3x256xf32>,
    return
  }
  func.func @transform_0(%arg0: i32, %arg1: i32) -> (i32, i32, i32) {
    %c0_i32 = arith.constant 0 : i32
    %c0_i32_0 = arith.constant 0 : i32
    return %arg0, %c0_i32, %arg1 : i32, i32, i32
  }
  func.func @transform_1(%arg0: i32, %arg1: i32) -> (i32, i32) {
    %c0_i32 = arith.constant 0 : i32
    %c0_i32_0 = arith.constant 0 : i32
    %c0_i32_1 = arith.constant 0 : i32
    return %c0_i32, %c0_i32_0 : i32, i32
  }
  func.func @transform_2(%arg0: i32, %arg1: i32) -> (i32, i32) {
    %c0_i32 = arith.constant 0 : i32
    %c0_i32_0 = arith.constant 0 : i32
    %c0_i32_1 = arith.constant 0 : i32
    return %c0_i32, %c0_i32_0 : i32, i32
  }
  func.func @transform_3(%arg0: i32, %arg1: i32) -> (i32, i32, i32) {
    %c0_i32 = arith.constant 0 : i32
    %c0_i32_0 = arith.constant 0 : i32
    return %arg0, %c0_i32, %arg1 : i32, i32, i32
  }
}

</mosaic_0001>

<bundles_post_ra>
// kernel: vgg_norm.1
= control target key start
LH: loop header
LB: loop body
LE: loop exit
PB: predicated region body
PF: predicated region fallthrough
CT: control target
= control target key end

     0   :  { %s416_s12 = smov 0   ;;  %s418_s13 = smov 0   ;;  %s455_s0 = inlined_call_operand.vmem [shape: f32[2,3,256], index: 0, kind: input, shape index: {}]   ;;  %s456_s1 = inlined_call_operand.vmem [shape: f32[3,1], index: 1, kind: input, shape index: {}]   ;;  %s457_s2 = inlined_call_operand.vmem [shape: f32[3,1], index: 2, kind: input, shape index: {}]   ;;  %s458_s3 = inlined_call_operand.vmem [shape: f32[2,3,256], index: 3, kind: output, shape index: {}]  }
   0x1   :  { %s420_s14 = smov 0  }
   0x2 LB: > { %s25_s15 = sadd.s32 1, %s388_s13  ;;  %p332_p0 = scmp.ge.s32.totalorder %s392_s14, 1  ;;  %s392_s14 = sphi %s420_s14, %s13_s14   ;;  %s388_s13 = sphi %s418_s13, %s460_s13   ;;  %s384_s12 = sphi %s416_s12, %s459_s12  }
   0x3   : > { %p27_p1 = scmp.ge.s32.totalorder %s25_s15, 2  ;;  %p158_p2 = scmp.lt.s32.totalorder %s392_s14, 3 }
   0x5   : > { %s462_s15 = smov (%p27_p1, %s25_s15), 0  ;;  %p159_p3 = pnand %p332_p0, %p158_p2 }
   0x6   : > { %v225_v0 = vld [vmem:[%s457_s2] sm:$0x7] (!%p159_p3)  ;;  %v394_v1 = vmov (!%p159_p3), 0   ;;  %v395_v3 = vmov (!%p159_p3), 839922192   ;;  %v219_v5 = vlaneseq (!%p159_p3)  ;;  %p191_p4 = scmp.lt.s32.totalorder (!%p159_p3), %s384_s12, 1 }
   0x7   : > { %162 = sbr.rel (%p159_p3) target bundleno = 152 (0x98), region = 32  ;;  %367 = vset.pattern.permute.xlu0 (!%p159_p3), %v394_v1  ;;  %v211_v2 = vld [vmem:[%s456_s1] sm:$0x7] (!%p159_p3)  ;;  %v217_v4 = vunpack.c.l.s4 (!%p159_p3), %v395_v3 }
   0x8   : > { %228 = vperm.xlu0 (!%p159_p3), %367, %v225_v0   ;;  %v220_v7 = vshrl.u32 (!%p159_p3), %v219_v5, 7 }
   0x9   : > { %v218_v6 = vunpack.c.0.s8 (!%p159_p3), %v217_v4 }
   0xb   : > { %v221_v8 = vsub.s32 (!%p159_p3), %v218_v6, %v220_v7 }
   0xc   : > { %214 = vperm.xlu0 (!%p159_p3), %367, %v211_v2  }
   0xe   : > { %s464_s12 = smov (!%p191_p4, %s384_s12), 1 }
   0xf   : > { %s339_s20 = sshll.u32 %s464_s12, 3 }
  0x10   : > { %s198_s23 = scalar_lea.vmem %s455_s0, %s339_s20  ;;  %s208_s26 = scalar_lea.vmem %s458_s3, %s339_s20 }
  0x11   : > { %v210_v13 = vld [vmem:[%s198_s23] sm:$0x77] }
  0x87   : > { %v229_v9 = vpop.permute.xlu0 %228 }
  0x88   : > { %v236_v10 = vrot.slane %v229_v9, %v221_v8 }
  0x8a   : > { %368 = vrcp.f32 %v236_v10 }
  0x8b   : > { %v215_v11 = vpop.permute.xlu0 %214 }
  0x8c   : > { %v222_v12 = vrot.slane %v215_v11, %v221_v8 }
  0x8e   : > { %v224_v14 = vsub.f32 %v210_v13, %v222_v12 }
  0x94   : > { %v369_v15 = vpop.eup %368 }
  0x95   : > { %v239_v16 = vmul.f32 %v369_v15, %v224_v14 }
  0x97   : > { %240 = vst [vmem:[%s208_s26] sm:$0x77] %v239_v16 }
  0x98 PF: > { %s13_s14 = sadd.s32 1, %s392_s14   ;;  %s459_s12 = smov %s388_s13 }
  0x99   : > { %p10_p5 = scmp.ge.s32.totalorder %s13_s14, 4   ;;  %s460_s13 = smov %s462_s15 }
  0x9b   :  { %12 = sbr.rel (!%p10_p5) target bundleno = 2 (0x2), region = 62 }

</bundles_post_ra>
